<compile_context>
chip_gen: v6e
topology: v6e:2x2x1
jax: 0.10.0
libtpu: 0.0.40
codegen_flags: <defaults>
</compile_context>

<pallas_src>
import jax
import jax.numpy as jnp
from jax.experimental import pallas as pl
from jax.experimental.pallas import tpu as pltpu


INPUT_SIZE = 512
SEX_IN = 1
SEX_OUT = 8
OUTPUT_SIZE = 1


def regression_kernel(x_ref, sex_ref, w4_ref, b4_ref,
                      w1x_ref, w1s_ref, b1_ref,
                      w3_ref, b3_ref, o_ref):
    # ---- linear4 + relu on the VPU (K=1 "matmul" is a broadcast mul) -------
    # sex: (TB,1) f32, w4: (1,8), b4: (1,8)  ->  (TB,8) f32
    sex8 = jnp.maximum(sex_ref[...] * w4_ref[...] + b4_ref[...], 0.0)

    # ---- linear1, x part: the only MXU matmul; cast f32 x -> bf16 in-kernel
    h = jnp.dot(x_ref[...].astype(w1x_ref.dtype), w1x_ref[...],
                preferred_element_type=jnp.float32)          # (TB,512) f32

    # ---- linear1, sex part: K=8 contraction on the VPU (8 broadcast MACs) --
    # avoids an MXU pass zero-padded from K=8 to the full contraction depth.
    h = h + b1_ref[...]
    for k in range(SEX_OUT):               # static unroll, hidden under MXU
        h = h + sex8[:, k:k + 1] * w1s_ref[k:k + 1, :]
    h = jnp.maximum(h, 0.0)                # (TB,512) f32

    # TODO(synk): nn.Dropout(p=0.4) is identity in eval mode; training-mode
    # stochastic dropout (pltpu.prng_*) intentionally not applied here.

    # ---- linear3 (N=1) as VPU multiply + lane (XLU) reduction ---------------
    o_ref[...] = (jnp.sum(h * w3_ref[...], axis=-1, keepdims=True)
                  + b3_ref[...])                             # (TB,1) f32
    # TODO(synk): output block stays (TB,1) (lane-sparse); switch to a
    # lane-dense (1,TB) layout only if masked stores show up in profiles.


def _round_up(n, m):
    return ((n + m - 1) // m) * m


def regression_forward(x, sex, params, *, block_b=1024, mxu_dtype=jnp.bfloat16):
    """x: (B, 512) f32, sex: (B, 1) f32  ->  (B, 1) f32."""
    w4, b4, w1x, w1s, b1, w3_row, b3 = params
    B = x.shape[0]

    # Batch tile: as large as possible, but megacore-aware -- for non-tiny
    # batches keep >= 2 grid steps so the "parallel" axis gives both v7x
    # TensorCores work (no-op on single-TC v5e/v6e).
    if B > 256:
        TB = min(block_b, _round_up(pl.cdiv(B, 2), 8))
    else:
        TB = min(block_b, B)
    num_tiles = pl.cdiv(B, TB)
    grid = (num_tiles,)

    # One-time weight cast for the MXU path (x itself stays f32 -> cast in-kernel).
    w1x_mxu = w1x.astype(mxu_dtype)

    def batch_spec(cols):
        return pl.BlockSpec((TB, cols), lambda i: (i, 0))

    def resident_spec(shape):            # constant index_map -> VMEM-resident
        return pl.BlockSpec(shape, lambda i: (0, 0))

    if num_tiles >= 2:                   # deepen x pipeline to 3 buffers
        x_spec = pl.BlockSpec((TB, INPUT_SIZE), lambda i: (i, 0),
                              pipeline_mode=pl.Buffered(3))
    else:
        x_spec = batch_spec(INPUT_SIZE)

    # VMEM budget: 3 x-buffers + f32 h/temporaries + resident weights + margin,
    # clamped to [32, 48] MiB (48 MiB keeps headroom under v7x's 64 MiB VMEM).
    x_item = jnp.dtype(x.dtype).itemsize
    vmem_est = (3 * TB * INPUT_SIZE * x_item        # pipelined x buffers
                + 6 * TB * INPUT_SIZE * 4           # h + elementwise temporaries
                + 4 * 1024 * 1024)                  # weights + misc margin
    vmem_bytes = int(min(48 * 1024 * 1024, max(32 * 1024 * 1024, vmem_est)))

    flops = 2 * B * (INPUT_SIZE * INPUT_SIZE + SEX_OUT * INPUT_SIZE
                     + INPUT_SIZE + SEX_OUT)
    bytes_accessed = (x.size * x_item + sex.size * 4
                      + w1x_mxu.size * jnp.dtype(mxu_dtype).itemsize
                      + (w1s.size + b1.size + w3_row.size
                         + w4.size + b4.size + b3.size) * 4
                      + B * OUTPUT_SIZE * 4)

    return pl.pallas_call(
        regression_kernel,
        out_shape=jax.ShapeDtypeStruct((B, OUTPUT_SIZE), jnp.float32),
        grid=grid,
        in_specs=[
            x_spec,                                    # x       (TB, 512) f32
            batch_spec(SEX_IN),                        # sex     (TB, 1)   f32
            resident_spec((SEX_IN, SEX_OUT)),          # w4      (1, 8)    f32
            resident_spec((1, SEX_OUT)),               # b4      (1, 8)    f32
            resident_spec((INPUT_SIZE, INPUT_SIZE)),   # w1x     (512,512) bf16
            resident_spec((SEX_OUT, INPUT_SIZE)),      # w1s     (8, 512)  f32
            resident_spec((1, INPUT_SIZE)),            # b1      (1, 512)  f32
            resident_spec((1, INPUT_SIZE)),            # w3 row  (1, 512)  f32
            resident_spec((1, OUTPUT_SIZE)),           # b3      (1, 1)    f32
        ],
        out_specs=batch_spec(OUTPUT_SIZE),
        compiler_params=pltpu.CompilerParams(
            dimension_semantics=("parallel",),         # shard batch tiles (v7x)
            vmem_limit_bytes=vmem_bytes),
        cost_estimate=pl.CostEstimate(flops=flops, transcendentals=0,
                                      bytes_accessed=bytes_accessed),
    )(x, sex, w4, b4, w1x_mxu, w1s, b1, w3_row, b3)


def init_params(key):
    """Deterministic PyTorch-style (uniform +/- 1/sqrt(fan_in)) init."""
    def linear(key, fan_in, fan_out):
        kw, kb = jax.random.split(key)
        bound = 1.0 / jnp.sqrt(jnp.float32(fan_in))
        # stored already transposed: (in, out)
        w = jax.random.uniform(kw, (fan_in, fan_out), jnp.float32, -bound, bound)
        b = jax.random.uniform(kb, (1, fan_out), jnp.float32, -bound, bound)
        return w, b

    k1, k3, k4 = jax.random.split(key, 3)
    # linear1: in = 512 + 8 = 520, out = 512 ; split rows into x-part / sex-part
    w1_full, b1 = linear(k1, INPUT_SIZE + SEX_OUT, INPUT_SIZE)
    w1x = w1_full[:INPUT_SIZE, :]            # (512, 512)
    w1s = w1_full[INPUT_SIZE:, :]            # (8, 512)
    # linear3: 512 -> 1 ; keep as a (1, 512) row for the VPU reduce
    w3, b3 = linear(k3, INPUT_SIZE, OUTPUT_SIZE)
    w3_row = w3.T                            # (1, 512)
    # linear4: 1 -> 8
    w4, b4 = linear(k4, SEX_IN, SEX_OUT)
    # (linear2 exists in __init__ but is unused in forward; omitted.)
    return (w4, b4, w1x, w1s, b1, w3_row, b3)


def regression_reference(x, sex, params, mxu_dtype=jnp.bfloat16):
    """Pure-JAX reference mirroring the kernel's precision."""
    w4, b4, w1x, w1s, b1, w3_row, b3 = params
    sex8 = jnp.maximum(sex * w4 + b4, 0.0)
    h = jnp.dot(x.astype(mxu_dtype), w1x.astype(mxu_dtype),
                preferred_element_type=jnp.float32)
    h = jnp.maximum(h + sex8 @ w1s + b1, 0.0)
    return jnp.sum(h * w3_row, axis=-1, keepdims=True) + b3


if __name__ == "__main__":
    key = jax.random.PRNGKey(0)
    kx, ks, kp, kx2, ks2, kx3, ks3 = jax.random.split(key, 7)

    params = init_params(kp)

    # --- small demo batch (B = 2): bf16-MXU path + f32-MXU fallback ---------
    B = 2
    x = jax.random.normal(kx, (B, INPUT_SIZE), jnp.float32)
    sex = jax.random.bernoulli(ks, 0.5, (B, SEX_IN)).astype(jnp.float32)

    out = jax.block_until_ready(regression_forward(x, sex, params))
    ref = regression_reference(x, sex, params)
    ref_f32 = regression_reference(x, sex, params, mxu_dtype=jnp.float32)
    assert out.shape == (B, OUTPUT_SIZE)
    assert jnp.allclose(out, ref, atol=1e-3, rtol=1e-3), (out, ref)
    # accuracy budget of the bf16 MXU path vs a true f32 forward
    assert jnp.allclose(out, ref_f32, atol=5e-2, rtol=5e-2), (out, ref_f32)

    out_f32 = jax.block_until_ready(
        regression_forward(x, sex, params, mxu_dtype=jnp.float32))
    assert jnp.allclose(out_f32, ref_f32, atol=1e-3, rtol=1e-3), (out_f32, ref_f32)

    # --- multi-step grid (B = 1024 -> two batch tiles, Buffered(3) path) ----
    B2 = 1024
    x2 = jax.random.normal(kx2, (B2, INPUT_SIZE), jnp.float32)
    sex2 = jax.random.bernoulli(ks2, 0.5, (B2, SEX_IN)).astype(jnp.float32)
    out2 = jax.block_until_ready(regression_forward(x2, sex2, params))
    ref2 = regression_reference(x2, sex2, params)
    assert out2.shape == (B2, OUTPUT_SIZE)
    assert jnp.allclose(out2, ref2, atol=1e-3, rtol=1e-3)

    # --- ragged batch (B = 1000): padded rows of the last tile are discarded
    B3 = 1000
    x3 = jax.random.normal(kx3, (B3, INPUT_SIZE), jnp.float32)
    sex3 = jax.random.bernoulli(ks3, 0.5, (B3, SEX_IN)).astype(jnp.float32)
    out3 = jax.block_until_ready(regression_forward(x3, sex3, params))
    ref3 = regression_reference(x3, sex3, params)
    assert out3.shape == (B3, OUTPUT_SIZE)
    assert jnp.allclose(out3, ref3, atol=1e-3, rtol=1e-3)

    print("KERNEL_OK")
</pallas_src>

<mosaic_0001>
module attributes {stable_mosaic.version = 11 : i64} {
  func.func @regression_kernel(%arg0: i32, %arg1: memref<2x512xf32, #tpu.memory_space<vmem>>, %arg2: memref<2x1xf32, #tpu.memory_space<vmem>>, %arg3: memref<1x8xf32, #tpu.memory_space<vmem>>, %arg4: memref<1x8xf32, #tpu.memory_space<vmem>>, %arg5: memref<512x512xbf16, #tpu.memory_space<vmem>>, %arg6: memref<8x512xf32, #tpu.memory_space<vmem>>, %arg7: memref<1x512xf32, #tpu.memory_space<vmem>>, %arg8: memref<1x512xf32, #tpu.memory_space<vmem>>, %arg9: memref<1x1xf32, #tpu.memory_space<vmem>>, %arg10: memref<2x1xf32, #tpu.memory_space<vmem>>) attributes {dimension_semantics = [#tpu.dimension_semantics<parallel>], iteration_bounds = array<i64: 1>, scalar_prefetch = 0 : i64, scratch_operands = 0 : i64, tpu.core_type = #tpu.core_type<tc>, window_params = [{transform_indices = @transform_0, window_bounds = array<i64: 2, 512>}, {transform_indices = @transform_1, window_bounds = array<i64: 2, 1>}, {pipeline_mode = #tpu.pipeline_mode<synchronous>, transform_indices = @transform_2, window_bounds = array<i64: 1, 8>}, {pipeline_mode = #tpu.pipeline_mode<synchronous>, transform_indices = @transform_3, window_bounds = array<i64: 1, 8>}, {pipeline_mode = #tpu.pipeline_mode<synchronous>, transform_indices = @transform_4, window_bounds = array<i64: 512, 512>}, {pipeline_mode = #tpu.pipeline_mode<synchronous>, transform_indices = @transform_5, window_bounds = array<i64: 8, 512>}, {pipeline_mode = #tpu.pipeline_mode<synchronous>, transform_indices = @transform_6, window_bounds = array<i64: 1, 512>}, {pipeline_mode = #tpu.pipeline_mode<synchronous>, transform_indices = @transform_7, window_bounds = array<i64: 1, 512>}, {pipeline_mode = #tpu.pipeline_mode<synchronous>, transform_indices = @transform_8, window_bounds = array<i64: 1, 1>}, {transform_indices = @transform_9, window_bounds = array<i64: 2, 1>}]} {
    %c0 = arith.constant 0 : index
    %c0_0 = arith.constant 0 : index
    %0 = vector.load %arg2[%c0, %c0_0] : memref<2x1xf32, #tpu.memory_space<vmem>>, vector<2x1xf32>
    %c0_1 = arith.constant 0 : index
    %c0_2 = arith.constant 0 : index
    %1 = vector.load %arg3[%c0_1, %c0_2] : memref<1x8xf32, #tpu.memory_space<vmem>>, vector<1x8xf32>
    %2 = vector.broadcast %0 : vector<2x1xf32> to vector<2x8xf32>
    %3 = vector.broadcast %1 : vector<1x8xf32> to vector<2x8xf32>
    %4 = arith.mulf %2, %3 : vector<2x8xf32>
    %c0_3 = arith.constant 0 : index
    %c0_4 = arith.constant 0 : index
    %5 = vector.load %arg4[%c0_3, %c0_4] : memref<1x8xf32, #tpu.memory_space<vmem>>, vector<1x8xf32>
    %6 = vector.broadcast %5 : vector<1x8xf32> to vector<2x8xf32>
    %7 = arith.addf %4, %6 : vector<2x8xf32>
    %cst = arith.constant 0.000000e+00 : f32
    %8 = vector.broadcast %cst : f32 to vector<2x8xf32>
    %9 = arith.maximumf %7, %8 : vector<2x8xf32>
    %c0_5 = arith.constant 0 : index
    %c0_6 = arith.constant 0 : index
    %10 = vector.load %arg1[%c0_5, %c0_6] : memref<2x512xf32, #tpu.memory_space<vmem>>, vector<2x512xf32>
    %11 = arith.truncf %10 : vector<2x512xf32> to vector<2x512xbf16>
    %c0_7 = arith.constant 0 : index
    %c0_8 = arith.constant 0 : index
    %12 = vector.load %arg5[%c0_7, %c0_8] : memref<512x512xbf16, #tpu.memory_space<vmem>>, vector<512x512xbf16>
    %cst_9 = arith.constant dense<0.000000e+00> : vector<2x512xf32>
    %13 = tpu.matmul %11, %12, %cst_9 {dimension_numbers = #tpu.dot_dimension_numbers<[1], [0], [0], [1], [0, 0, 1, 1], [], []>} : vector<2x512xbf16>, vector<512x512xbf16>, vector<2x512xf32> -> vector<2x512xf32>
    %c0_10 = arith.constant 0 : index
    %c0_11 = arith.constant 0 : index
    %14 = vector.load %arg7[%c0_10, %c0_11] : memref<1x512xf32, #tpu.memory_space<vmem>>, vector<1x512xf32>
    %15 = vector.broadcast %14 : vector<1x512xf32> to vector<2x512xf32>
    %16 = arith.addf %13, %15 : vector<2x512xf32>
    %17 = vector.extract_strided_slice %9 {offsets = [0, 0], sizes = [2, 1], strides = [1, 1]} : vector<2x8xf32> to vector<2x1xf32>
    %c0_12 = arith.constant 0 : index
    %c0_13 = arith.constant 0 : index
    %18 = vector.load %arg6[%c0_12, %c0_13] : memref<8x512xf32, #tpu.memory_space<vmem>>, vector<1x512xf32>
    %19 = vector.broadcast %17 : vector<2x1xf32> to vector<2x512xf32>
    %20 = vector.broadcast %18 : vector<1x512xf32> to vector<2x512xf32>
    %21 = arith.mulf %19, %20 : vector<2x512xf32>
    %22 = arith.addf %16, %21 : vector<2x512xf32>
    %23 = vector.extract_strided_slice %9 {offsets = [0, 1], sizes = [2, 1], strides = [1, 1]} : vector<2x8xf32> to vector<2x1xf32>
    %c1 = arith.constant 1 : index
    %c0_14 = arith.constant 0 : index
    %24 = vector.load %arg6[%c1, %c0_14] : memref<8x512xf32, #tpu.memory_space<vmem>>, vector<1x512xf32>
    %25 = vector.broadcast %23 : vector<2x1xf32> to vector<2x512xf32>
    %26 = vector.broadcast %24 : vector<1x512xf32> to vector<2x512xf32>
    %27 = arith.mulf %25, %26 : vector<2x512xf32>
    %28 = arith.addf %22, %27 : vector<2x512xf32>
    %29 = vector.extract_strided_slice %9 {offsets = [0, 2], sizes = [2, 1], strides = [1, 1]} : vector<2x8xf32> to vector<2x1xf32>
    %c2 = arith.constant 2 : index
    %c0_15 = arith.constant 0 : index
    %30 = vector.load %arg6[%c2, %c0_15] : memref<8x512xf32, #tpu.memory_space<vmem>>, vector<1x512xf32>
    %31 = vector.broadcast %29 : vector<2x1xf32> to vector<2x512xf32>
    %32 = vector.broadcast %30 : vector<1x512xf32> to vector<2x512xf32>
    %33 = arith.mulf %31, %32 : vector<2x512xf32>
    %34 = arith.addf %28, %33 : vector<2x512xf32>
    %35 = vector.extract_strided_slice %9 {offsets = [0, 3], sizes = [2, 1], strides = [1, 1]} : vector<2x8xf32> to vector<2x1xf32>
    %c3 = arith.constant 3 : index
    %c0_16 = arith.constant 0 : index
    %36 = vector.load %arg6[%c3, %c0_16] : memref<8x512xf32, #tpu.memory_space<vmem>>, vector<1x512xf32>
    %37 = vector.broadcast %35 : vector<2x1xf32> to vector<2x512xf32>
    %38 = vector.broadcast %36 : vector<1x512xf32> to vector<2x512xf32>
    %39 = arith.mulf %37, %38 : vector<2x512xf32>
    %40 = arith.addf %34, %39 : vector<2x512xf32>
    %41 = vector.extract_strided_slice %9 {offsets = [0, 4], sizes = [2, 1], strides = [1, 1]} : vector<2x8xf32> to vector<2x1xf32>
    %c4 = arith.constant 4 : index
    %c0_17 = arith.constant 0 : index
    %42 = vector.load %arg6[%c4, %c0_17] : memref<8x512xf32, #tpu.memory_space<vmem>>, vector<1x512xf32>
    %43 = vector.broadcast %41 : vector<2x1xf32> to vector<2x512xf32>
    %44 = vector.broadcast %42 : vector<1x512xf32> to vector<2x512xf32>
    %45 = arith.mulf %43, %44 : vector<2x512xf32>
    %46 = arith.addf %40, %45 : vector<2x512xf32>
    %47 = vector.extract_strided_slice %9 {offsets = [0, 5], sizes = [2, 1], strides = [1, 1]} : vector<2x8xf32> to vector<2x1xf32>
    %c5 = arith.constant 5 : index
    %c0_18 = arith.constant 0 : index
    %48 = vector.load %arg6[%c5, %c0_18] : memref<8x512xf32, #tpu.memory_space<vmem>>, vector<1x512xf32>
    %49 = vector.broadcast %47 : vector<2x1xf32> to vector<2x512xf32>
    %50 = vector.broadcast %48 : vector<1x512xf32> to vector<2x512xf32>
    %51 = arith.mulf %49, %50 : vector<2x512xf32>
    %52 = arith.addf %46, %51 : vector<2x512xf32>
    %53 = vector.extract_strided_slice %9 {offsets = [0, 6], sizes = [2, 1], strides = [1, 1]} : vector<2x8xf32> to vector<2x1xf32>
    %c6 = arith.constant 6 : index
    %c0_19 = arith.constant 0 : index
    %54 = vector.load %arg6[%c6, %c0_19] : memref<8x512xf32, #tpu.memory_space<vmem>>, vector<1x512xf32>
    %55 = vector.broadcast %53 : vector<2x1xf32> to vector<2x512xf32>
    %56 = vector.broadcast %54 : vector<1x512xf32> to vector<2x512xf32>
    %57 = arith.mulf %55, %56 : vector<2x512xf32>
    %58 = arith.addf %52, %57 : vector<2x512xf32>
    %59 = vector.extract_strided_slice %9 {offsets = [0, 7], sizes = [2, 1], strides = [1, 1]} : vector<2x8xf32> to vector<2x1xf32>
    %c7 = arith.constant 7 : index
    %c0_20 = arith.constant 0 : index
    %60 = vector.load %arg6[%c7, %c0_20] : memref<8x512xf32, #tpu.memory_space<vmem>>, vector<1x512xf32>
    %61 = vector.broadcast %59 : vector<2x1xf32> to vector<2x512xf32>
    %62 = vector.broadcast %60 : vector<1x512xf32> to vector<2x512xf32>
    %63 = arith.mulf %61, %62 : vector<2x512xf32>
    %64 = arith.addf %58, %63 : vector<2x512xf32>
    %cst_21 = arith.constant 0.000000e+00 : f32
    %65 = vector.broadcast %cst_21 : f32 to vector<2x512xf32>
    %66 = arith.maximumf %64, %65 : vector<2x512xf32>
    %c0_22 = arith.constant 0 : index
    %c0_23 = arith.constant 0 : index
    %67 = vector.load %arg8[%c0_22, %c0_23] : memref<1x512xf32, #tpu.memory_space<vmem>>, vector<1x512xf32>
    %68 = vector.broadcast %67 : vector<1x512xf32> to vector<2x512xf32>
    %69 = arith.mulf %66, %68 : vector<2x512xf32>
    %cst_24 = arith.constant dense<0.000000e+00> : vector<2xf32>
    %70 = vector.multi_reduction <add>, %69, %cst_24 [1] : vector<2x512xf32> to vector<2xf32>
    %71 = vector.shape_cast %70 : vector<2xf32> to vector<2x1xf32>
    %c0_25 = arith.constant 0 : index
    %c0_26 = arith.constant 0 : index
    %72 = vector.load %arg9[%c0_25, %c0_26] : memref<1x1xf32, #tpu.memory_space<vmem>>, vector<1x1xf32>
    %73 = vector.broadcast %72 : vector<1x1xf32> to vector<2x1xf32>
    %74 = arith.addf %71, %73 : vector<2x1xf32>
    %c0_27 = arith.constant 0 : index
    %c0_28 = arith.constant 0 : index
    %75 = vector.load %arg10[%c0_27, %c0_28] : memref<2x1xf32, #tpu.memory_space<vmem>>, vector<2x1xf32>
    tpu.vector_store %arg10[%c0_27, %c0_28], %74 {strides = array<i32>} : memref<2x1xf32, #tpu.memory_space<vmem>>, vector<2x1xf32>,
    return
  }
  func.func @transform_0(%arg0: i32) -> (i32, i32) {
    %c0_i32 = arith.constant 0 : i32
    %c0_i32_0 = arith.constant 0 : i32
    return %arg0, %c0_i32 : i32, i32
  }
  func.func @transform_1(%arg0: i32) -> (i32, i32) {
    %c0_i32 = arith.constant 0 : i32
    %c0_i32_0 = arith.constant 0 : i32
    return %arg0, %c0_i32 : i32, i32
  }
  func.func @transform_2(%arg0: i32) -> (i32, i32) {
    %c0_i32 = arith.constant 0 : i32
    %c0_i32_0 = arith.constant 0 : i32
    %c0_i32_1 = arith.constant 0 : i32
    return %c0_i32, %c0_i32_0 : i32, i32
  }
  func.func @transform_3(%arg0: i32) -> (i32, i32) {
    %c0_i32 = arith.constant 0 : i32
    %c0_i32_0 = arith.constant 0 : i32
    %c0_i32_1 = arith.constant 0 : i32
    return %c0_i32, %c0_i32_0 : i32, i32
  }
  func.func @transform_4(%arg0: i32) -> (i32, i32) {
    %c0_i32 = arith.constant 0 : i32
    %c0_i32_0 = arith.constant 0 : i32
    %c0_i32_1 = arith.constant 0 : i32
    return %c0_i32, %c0_i32_0 : i32, i32
  }
  func.func @transform_5(%arg0: i32) -> (i32, i32) {
    %c0_i32 = arith.constant 0 : i32
    %c0_i32_0 = arith.constant 0 : i32
    %c0_i32_1 = arith.constant 0 : i32
    return %c0_i32, %c0_i32_0 : i32, i32
  }
  func.func @transform_6(%arg0: i32) -> (i32, i32) {
    %c0_i32 = arith.constant 0 : i32
    %c0_i32_0 = arith.constant 0 : i32
    %c0_i32_1 = arith.constant 0 : i32
    return %c0_i32, %c0_i32_0 : i32, i32
  }
  func.func @transform_7(%arg0: i32) -> (i32, i32) {
    %c0_i32 = arith.constant 0 : i32
    %c0_i32_0 = arith.constant 0 : i32
    %c0_i32_1 = arith.constant 0 : i32
    return %c0_i32, %c0_i32_0 : i32, i32
  }
  func.func @transform_8(%arg0: i32) -> (i32, i32) {
    %c0_i32 = arith.constant 0 : i32
    %c0_i32_0 = arith.constant 0 : i32
    %c0_i32_1 = arith.constant 0 : i32
    return %c0_i32, %c0_i32_0 : i32, i32
  }
  func.func @transform_9(%arg0: i32) -> (i32, i32) {
    %c0_i32 = arith.constant 0 : i32
    %c0_i32_0 = arith.constant 0 : i32
    return %arg0, %c0_i32 : i32, i32
  }
}

</mosaic_0001>

<bundles_post_ra>
// kernel: tpu_custom_call.1
= control target key start
LH: loop header
LB: loop body
LE: loop exit
PB: predicated region body
PF: predicated region fallthrough
CT: control target
= control target key end

     0   :  { %s2112_s0 = inlined_call_operand.hbm [shape: f32[2,512], index: 0, kind: input, shape index: {}]   ;;  %s2113_s1 = inlined_call_operand.vmem [shape: f32[2,1], index: 1, kind: input, shape index: {}]   ;;  %s2114_s2 = inlined_call_operand.hbm [shape: f32[1,8], index: 2, kind: input, shape index: {}]   ;;  %s2115_s3 = inlined_call_operand.vmem [shape: f32[1,8], index: 3, kind: input, shape index: {}]   ;;  %s2116_s4 = inlined_call_operand.hbm [shape: bf16[512,512], index: 4, kind: input, shape index: {}]   ;;  %s2117_s5 = inlined_call_operand.hbm [shape: f32[8,512], index: 5, kind: input, shape index: {}]   ;;  %s2118_s6 = inlined_call_operand.vmem [shape: f32[1,512], index: 6, kind: input, shape index: {}]   ;;  %s2119_s7 = inlined_call_operand.vmem [shape: f32[1,512], index: 7, kind: input, shape index: {}]   ;;  %s2120_s8 = inlined_call_operand.<no memory space> [shape: f32[1,1], index: 8, kind: input, shape index: {}]   ;;  %s2121_s9 = inlined_call_operand.vmem [shape: f32[2,1], index: 9, kind: output, shape index: {}]  }
   0x1   :  { %v14_v0 = vstv %s2120_s8 }
   0x2   :  { %15 = vst [vmem:[#allocation2] sm:$0x1] %v14_v0 }
   0x3   :  { %16 = vsyncpa [#allocation4], 0 }
   0x4   :  { %17 = vsyncpa [#allocation6], 0 }
   0x5   :  { %18 = vsyncpa [#allocation9], 0  ;;  %s1858_s11 = smov [#allocation5]   ;;  %s1859_s13 = smov [#allocation3]  }
   0x6   :  { %s37_s12 = sshll.u32 %s1858_s11, 4  ;;  %s25_s14 = sshll.u32 %s1859_s13, 4  ;;  %s38_s12 = int_to_ptr.vmem [resolvable:$true] %s37_s12  ;;  %s26_s14 = int_to_ptr.vmem [resolvable:$true] %s25_s14 }
   0x7   :  { %s1780_s15 = scalar_lea.vmem %s38_s12, 16  ;;  %s1784_s16 = scalar_lea.vmem %s38_s12, 32 }
   0x8   :  { %p1781_p0 = scmp.ne.s32.totalorder %s38_s12, %s1780_s15  ;;  %p1785_p1 = scmp.lt.s32.totalorder %s38_s12, %s38_s12 }
   0x9   :  { %p1786_p2 = scmp.lt.s32.totalorder %s1784_s16, %s1780_s15 }
   0xb   :  { %p1787_p3 = por %p1786_p2, %p1785_p1 }
   0xd   :  { %p1788_p4 = pnand %p1787_p3, %p1781_p0 }
   0xf   :  { %1791 = shalt.err (!%p1788_p4)
}
  0x10   :  { %40 = dma.hbm_to_vmem [thread:$0]  %s2114_s2, 16, %s38_s12, [#allocation6]  }
  0x11   :  { %s1800_s18 = scalar_lea.vmem %s26_s14, 128  ;;  %p1805_p6 = scmp.lt.s32.totalorder %s26_s14, %s26_s14 }
  0x12   :  { %p1801_p5 = scmp.ne.s32.totalorder %s26_s14, %s1800_s18  ;;  %p1806_p7 = scmp.lt.s32.totalorder %s1800_s18, %s1800_s18 }
  0x14   :  { %p1807_p8 = por %p1806_p7, %p1805_p6 }
  0x16   :  { %p1808_p9 = pnand %p1807_p8, %p1801_p5 }
  0x18   :  { %1811 = shalt.err (!%p1808_p9)
}
  0x19   :  { %28 = dma.hbm_to_vmem [thread:$0]  %s2112_s0, 128, %s26_s14, [#allocation4]  }
  0x1a   :  { %s1860_s21 = smov [#allocation7]  }
  0x1b   :  { %s48_s22 = sshll.u32 %s1860_s21, 4  ;;  %s49_s22 = int_to_ptr.vmem [resolvable:$true] %s48_s22 }
  0x1c   :  { %s1820_s23 = scalar_lea.vmem %s49_s22, 16384  ;;  %p1825_p11 = scmp.lt.s32.totalorder %s49_s22, %s49_s22 }
  0x1d   :  { %p1821_p10 = scmp.ne.s32.totalorder %s49_s22, %s1820_s23  ;;  %p1826_p12 = scmp.lt.s32.totalorder %s1820_s23, %s1820_s23 }
  0x1f   :  { %p1827_p13 = por %p1826_p12, %p1825_p11 }
  0x21   :  { %p1828_p0 = pnand %p1827_p13, %p1821_p10 }
  0x23   :  { %1831 = shalt.err (!%p1828_p0)
}
  0x24   :  { %s1861_s2 = smov 256   ;;  %s1862_s24 = smov 16  }
  0x25   :  { %54 = dma.hbm_to_vmem [thread:$0]  %s2116_s4, 16384, %s49_s22, [#allocation6], %s1861_s2, %s1861_s2, %s1862_s24  }
  0x26   :  { %s1863_s27 = smov [#allocation8]  }
  0x27   :  { %s61_s28 = sshll.u32 %s1863_s27, 4  ;;  %s62_s28 = int_to_ptr.vmem [resolvable:$true] %s61_s28 }
  0x28   :  { %s1840_s0 = scalar_lea.vmem %s62_s28, 512  ;;  %p1845_p2 = scmp.lt.s32.totalorder %s62_s28, %s62_s28 }
  0x29   :  { %p1841_p1 = scmp.ne.s32.totalorder %s62_s28, %s1840_s0  ;;  %p1846_p3 = scmp.lt.s32.totalorder %s1840_s0, %s1840_s0 }
  0x2b   :  { %p1847_p4 = por %p1846_p3, %p1845_p2 }
  0x2d   :  { %p1848_p5 = pnand %p1847_p4, %p1841_p1 }
  0x2f   :  { %1851 = shalt.err (!%p1848_p5)
}
  0x30   :  { %64 = dma.hbm_to_vmem [thread:$0]  %s2117_s5, 512, %s62_s28, [#allocation9]  }
  0x31   :  { %1852 = dma.done.wait [#allocation4], 128  }
  0x32   :  { %1853 = vsyncadd [#allocation4], 4294967168 }
  0x33   :  { %1854 = dma.done.wait [#allocation6], 16400  }
  0x34   :  { %1855 = vsyncadd [#allocation6], 4294950896 }
  0x35   :  { %1856 = dma.done.wait [#allocation9], 512  }
  0x36   :  { %1857 = vsyncadd [#allocation9], 4294966784  ;;  %v1864_v1 = vmov 0   ;;  %v83_v2 = vld [vmem:[%s2113_s1] sm:$0x3]  ;;  %v1865_v7 = vmov 1   ;;  %v112_v42 = vlaneseq }
  0x37   :  { %1570 = vset.pattern.permute.xlu0 %v1864_v1  ;;  %v1579_v3 = vld [vmem:[#allocation7 + $0xe4] ss:$16 sps:$4 sm:$0xff]   ;;  %v1583_v5 = vld [vmem:[#allocation7 + $0xe0] ss:$16 sps:$4 sm:$0xff]   ;;  %1571 = vset.pattern.permute.xlu1 %v1865_v7  ;;  %v1866_v40 = vmov 1983009808  }
  0x38   :  { %87 = vperm.xlu0 %1570, %v83_v2   ;;  %v1581_v4 = vld [vmem:[#allocation7 + $0x2e4] ss:$16 sps:$4 sm:$0xff]   ;;  %v1584_v6 = vld [vmem:[#allocation7 + $0x2e0] ss:$16 sps:$4 sm:$0xff]   ;;  %923 = vmatprep.subr.bf16.mxu0 %v1579_v3  ;;  %v110_v41 = vunpack.c.l.s4 %v1866_v40  ;;  %v1941_v47 = vshrl.u32 %v112_v42, 7  ;;  %vm1397_vm0 = vcmask 1041408  }
  0x39   :  { %v1585_v8 = vld [vmem:[#allocation7 + $0xc4] ss:$16 sps:$4 sm:$0xff]   ;;  %964 = vmatprep.subr.bf16.mxu1 %v1581_v4  ;;  %924 = vmatpush1.bf16.msra.mxu0 %v1583_v5  ;;  %v1589_v10 = vld [vmem:[#allocation7 + $0xc0] ss:$16 sps:$4 sm:$0xff]   ;;  %v1708_v40 = vld [vmem:[#allocation7 + $0x4c] ss:$16 sps:$4 sm:$0xff]  }
  0x3a   :  { %v1587_v9 = vld [vmem:[#allocation7 + $0x2c4] ss:$16 sps:$4 sm:$0xff]   ;;  %965 = vmatpush1.bf16.msra.mxu1 %v1584_v6  ;;  %925 = vmatprep.subr.bf16.mxu0 %v1585_v8  ;;  %v1590_v11 = vld [vmem:[#allocation7 + $0x2c0] ss:$16 sps:$4 sm:$0xff]   ;;  %v111_v46 = vunpack.c.0.s8 %v110_v41  ;;  %v1711_v41 = vld [vmem:[#allocation7 + $0x24c] ss:$16 sps:$4 sm:$0xff]  }
  0x3b   :  { %966 = vmatprep.subr.bf16.mxu1 %v1587_v9  ;;  %v1591_v12 = vld [vmem:[#allocation7 + $0xa4] ss:$16 sps:$4 sm:$0xff]   ;;  %v1595_v14 = vld [vmem:[#allocation7 + $0xa0] ss:$16 sps:$4 sm:$0xff]   ;;  %v1706_v42 = vld [vmem:[#allocation7 + $0x48] ss:$16 sps:$4 sm:$0xff]  }
  0x3c   :  { %v1593_v13 = vld [vmem:[#allocation7 + $0x2a4] ss:$16 sps:$4 sm:$0xff]   ;;  %v1596_v15 = vld [vmem:[#allocation7 + $0x2a0] ss:$16 sps:$4 sm:$0xff]   ;;  %v114_v53 = vsub.s32 %v111_v46, %v1941_v47  ;;  %v1712_v46 = vld [vmem:[#allocation7 + $0x28] ss:$16 sps:$4 sm:$0xff]  }
  0x3d   :  { %926 = vmatpush1.bf16.msra.mxu0 %v1589_v10  ;;  %v1597_v16 = vld [vmem:[#allocation7 + $0x84] ss:$16 sps:$4 sm:$0xff]   ;;  %v1601_v18 = vld [vmem:[#allocation7 + $0x80] ss:$16 sps:$4 sm:$0xff]   ;;  %vm1415_vm1 = vcmask 1024  }
  0x3e   :  { %967 = vmatpush1.bf16.msra.mxu1 %v1590_v11  ;;  %927 = vmatprep.subr.bf16.mxu0 %v1591_v12  ;;  %v1599_v17 = vld [vmem:[#allocation7 + $0x284] ss:$16 sps:$4 sm:$0xff]   ;;  %v1602_v19 = vld [vmem:[#allocation7 + $0x280] ss:$16 sps:$4 sm:$0xff]  }
  0x3f   :  { %968 = vmatprep.subr.bf16.mxu1 %v1593_v13  ;;  %v1603_v20 = vld [vmem:[#allocation7 + $0x64] ss:$16 sps:$4 sm:$0xff]   ;;  %v1607_v22 = vld [vmem:[#allocation7 + $0x60] ss:$16 sps:$4 sm:$0xff]  }
  0x40   :  { %v1605_v21 = vld [vmem:[#allocation7 + $0x264] ss:$16 sps:$4 sm:$0xff]   ;;  %v1608_v23 = vld [vmem:[#allocation7 + $0x260] ss:$16 sps:$4 sm:$0xff]  }
  0x41   :  { %928 = vmatpush1.bf16.msra.mxu0 %v1595_v14  ;;  %v1609_v24 = vld [vmem:[#allocation7 + $0x44] ss:$16 sps:$4 sm:$0xff]   ;;  %v1613_v26 = vld [vmem:[#allocation7 + $0x40] ss:$16 sps:$4 sm:$0xff]  }
  0x42   :  { %969 = vmatpush1.bf16.msra.mxu1 %v1596_v15  ;;  %929 = vmatprep.subr.bf16.mxu0 %v1597_v16  ;;  %v1611_v25 = vld [vmem:[#allocation7 + $0x244] ss:$16 sps:$4 sm:$0xff]   ;;  %v1614_v27 = vld [vmem:[#allocation7 + $0x240] ss:$16 sps:$4 sm:$0xff]  }
  0x43   :  { %970 = vmatprep.subr.bf16.mxu1 %v1599_v17  ;;  %v1615_v28 = vld [vmem:[#allocation7 + $0x24] ss:$16 sps:$4 sm:$0xff]   ;;  %v1619_v30 = vld [vmem:[#allocation7 + $0x20] ss:$16 sps:$4 sm:$0xff]  }
  0x44   :  { %v1617_v29 = vld [vmem:[#allocation7 + $0x224] ss:$16 sps:$4 sm:$0xff]   ;;  %v1620_v31 = vld [vmem:[#allocation7 + $0x220] ss:$16 sps:$4 sm:$0xff]  }
  0x45   :  { %930 = vmatpush1.bf16.msra.mxu0 %v1601_v18  ;;  %v1621_v32 = vld [vmem:[#allocation7 + $0x4] ss:$16 sps:$4 sm:$0xff]   ;;  %v1625_v34 = vld [vmem:[#allocation7] ss:$16 sps:$4 sm:$0xff]   ;;  %v1678_v18 = vld [vmem:[#allocation7 + $0xec] ss:$16 sps:$4 sm:$0xff]  }
  0x46   :  { %971 = vmatpush1.bf16.msra.mxu1 %v1602_v19  ;;  %931 = vmatprep.subr.bf16.mxu0 %v1603_v20  ;;  %v1623_v33 = vld [vmem:[#allocation7 + $0x204] ss:$16 sps:$4 sm:$0xff]   ;;  %v1626_v35 = vld [vmem:[#allocation7 + $0x200] ss:$16 sps:$4 sm:$0xff]   ;;  %v1681_v19 = vld [vmem:[#allocation7 + $0x2ec] ss:$16 sps:$4 sm:$0xff]  }
  0x47   :  { %972 = vmatprep.subr.bf16.mxu1 %v1605_v21  ;;  %v1627_v36 = vld [vmem:[#allocation7 + $0x1e4] ss:$16 sps:$4 sm:$0xff]   ;;  %v1631_v38 = vld [vmem:[#allocation7 + $0x1e0] ss:$16 sps:$4 sm:$0xff]  }
  0x48   :  { %v1629_v37 = vld [vmem:[#allocation7 + $0x3e4] ss:$16 sps:$4 sm:$0xff]   ;;  %v1632_v39 = vld [vmem:[#allocation7 + $0x3e0] ss:$16 sps:$4 sm:$0xff]  }
  0x49   :  { %932 = vmatpush1.bf16.msra.mxu0 %v1607_v22  ;;  %v1633_v43 = vld [vmem:[#allocation7 + $0x1c4] ss:$16 sps:$4 sm:$0xff]   ;;  %v1637_v45 = vld [vmem:[#allocation7 + $0x1c0] ss:$16 sps:$4 sm:$0xff]   ;;  %v1676_v22 = vld [vmem:[#allocation7 + $0xe8] ss:$16 sps:$4 sm:$0xff]  }
  0x4a   :  { %973 = vmatpush1.bf16.msra.mxu1 %v1608_v23  ;;  %933 = vmatprep.subr.bf16.mxu0 %v1609_v24  ;;  %v1635_v44 = vld [vmem:[#allocation7 + $0x3c4] ss:$16 sps:$4 sm:$0xff]   ;;  %v1638_v48 = vld [vmem:[#allocation7 + $0x3c0] ss:$16 sps:$4 sm:$0xff]   ;;  %v1679_v23 = vld [vmem:[#allocation7 + $0x2e8] ss:$16 sps:$4 sm:$0xff]  }
  0x4b   :  { %974 = vmatprep.subr.bf16.mxu1 %v1611_v25  ;;  %v1639_v49 = vld [vmem:[#allocation7 + $0x1a4] ss:$16 sps:$4 sm:$0xff]   ;;  %v1643_v51 = vld [vmem:[#allocation7 + $0x1a0] ss:$16 sps:$4 sm:$0xff]   ;;  %v1684_v24 = vld [vmem:[#allocation7 + $0xcc] ss:$16 sps:$4 sm:$0xff]  }
  0x4c   :  { %v1641_v50 = vld [vmem:[#allocation7 + $0x3a4] ss:$16 sps:$4 sm:$0xff]   ;;  %v1644_v52 = vld [vmem:[#allocation7 + $0x3a0] ss:$16 sps:$4 sm:$0xff]   ;;  %v1687_v25 = vld [vmem:[#allocation7 + $0x2cc] ss:$16 sps:$4 sm:$0xff]  }
  0x4d   :  { %934 = vmatpush1.bf16.msra.mxu0 %v1613_v26  ;;  %v1645_v54 = vld [vmem:[#allocation7 + $0x184] ss:$16 sps:$4 sm:$0xff]   ;;  %v1649_v57 = vld [vmem:[#allocation7 + $0x180] ss:$16 sps:$4 sm:$0xff]   ;;  %v1682_v26 = vld [vmem:[#allocation7 + $0xc8] ss:$16 sps:$4 sm:$0xff]  }
  0x4e   :  { %975 = vmatpush1.bf16.msra.mxu1 %v1614_v27  ;;  %935 = vmatprep.subr.bf16.mxu0 %v1615_v28  ;;  %v1647_v55 = vld [vmem:[#allocation7 + $0x384] ss:$16 sps:$4 sm:$0xff]   ;;  %v1650_v60 = vld [vmem:[#allocation7 + $0x380] ss:$16 sps:$4 sm:$0xff]   ;;  %v1685_v27 = vld [vmem:[#allocation7 + $0x2c8] ss:$16 sps:$4 sm:$0xff]  }
  0x4f   :  { %976 = vmatprep.subr.bf16.mxu1 %v1617_v29  ;;  %v106_v56 = vld [vmem:[#allocation3] sm:$0xff]  ;;  %v1655_v1 = vld [vmem:[#allocation7 + $0x160] ss:$16 sps:$4 sm:$0xff]  }
  0x50   :  { %v115_v58 = vrot.slane %v106_v56, %v114_v53  ;;  %v108_v59 = vcombine.high %v106_v56, %v106_v56  ;;  %v1651_v61 = vld [vmem:[#allocation7 + $0x164] ss:$16 sps:$4 sm:$0xff]   ;;  %v1656_v4 = vld [vmem:[#allocation7 + $0x360] ss:$16 sps:$4 sm:$0xff]   ;;  %v1690_v28 = vld [vmem:[#allocation7 + $0xac] ss:$16 sps:$4 sm:$0xff]  }
  0x51   :  { %936 = vmatpush1.bf16.msra.mxu0 %v1619_v30  ;;  %v1653_v62 = vld [vmem:[#allocation7 + $0x364] ss:$16 sps:$4 sm:$0xff]   ;;  %v1661_v8 = vld [vmem:[#allocation7 + $0x140] ss:$16 sps:$4 sm:$0xff]   ;;  %v1693_v29 = vld [vmem:[#allocation7 + $0x2ac] ss:$16 sps:$4 sm:$0xff]  }
  0x52   :  { %977 = vmatpush1.bf16.msra.mxu1 %v1620_v31  ;;  %937 = vmatprep.subr.bf16.mxu0 %v1621_v32  ;;  %v123_v63 = vcombine.high %v115_v58, %v115_v58  ;;  %v122_v0 = vrot.slane %v108_v59, %v114_v53  ;;  %v1657_v5 = vld [vmem:[#allocation7 + $0x144] ss:$16 sps:$4 sm:$0xff]   ;;  %v1662_v9 = vld [vmem:[#allocation7 + $0x340] ss:$16 sps:$4 sm:$0xff]   ;;  %v1944_v20 = vpack.c.bf16 %v115_v58, %v115_v58  ;;  %v1688_v30 = vld [vmem:[#allocation7 + $0xa8] ss:$16 sps:$4 sm:$0xff]  }
  0x53   :  { %978 = vmatprep.subr.bf16.mxu1 %v1623_v33  ;;  %v1659_v6 = vld [vmem:[#allocation7 + $0x344] ss:$16 sps:$4 sm:$0xff]   ;;  %v1667_v12 = vld [vmem:[#allocation7 + $0x120] ss:$16 sps:$4 sm:$0xff]   ;;  %v1691_v31 = vld [vmem:[#allocation7 + $0x2a8] ss:$16 sps:$4 sm:$0xff]  }
  0x54   :  { %v130_v2 = vpack.c.bf16 %v123_v63, %v123_v63  ;;  %v124_v3 = vcombine.high %v122_v0, %v122_v0  ;;  %v1663_v10 = vld [vmem:[#allocation7 + $0x124] ss:$16 sps:$4 sm:$0xff]   ;;  %v1668_v13 = vld [vmem:[#allocation7 + $0x320] ss:$16 sps:$4 sm:$0xff]   ;;  %v1946_v21 = vpack.c.bf16 %v122_v0, %v122_v0  ;;  %v1696_v32 = vld [vmem:[#allocation7 + $0x8c] ss:$16 sps:$4 sm:$0xff]  }
  0x55   :  { %938 = vmatpush1.bf16.msra.mxu0 %v1625_v34  ;;  %v1665_v11 = vld [vmem:[#allocation7 + $0x324] ss:$16 sps:$4 sm:$0xff]   ;;  %v1673_v16 = vld [vmem:[#allocation7 + $0x100] ss:$16 sps:$4 sm:$0xff]   ;;  %v1699_v33 = vld [vmem:[#allocation7 + $0x28c] ss:$16 sps:$4 sm:$0xff]  }
  0x56   :  { %979 = vmatpush1.bf16.msra.mxu1 %v1626_v35  ;;  %939 = vmatprep.subr.bf16.mxu0 %v1627_v36  ;;  %v132_v7 = vpack.c.bf16 %v124_v3, %v124_v3  ;;  %v1669_v14 = vld [vmem:[#allocation7 + $0x104] ss:$16 sps:$4 sm:$0xff]   ;;  %v1674_v17 = vld [vmem:[#allocation7 + $0x300] ss:$16 sps:$4 sm:$0xff]   ;;  %v1694_v34 = vld [vmem:[#allocation7 + $0x88] ss:$16 sps:$4 sm:$0xff]  }
  0x57   :  { %980 = vmatprep.subr.bf16.mxu1 %v1629_v37  ;;  %955 = vmatprep.mubr.bf16.mxu0 %v130_v2  ;;  %v1671_v15 = vld [vmem:[#allocation7 + $0x304] ss:$16 sps:$4 sm:$0xff]   ;;  %v1697_v35 = vld [vmem:[#allocation7 + $0x288] ss:$16 sps:$4 sm:$0xff]   ;;  %v1702_v36 = vld [vmem:[#allocation7 + $0x6c] ss:$16 sps:$4 sm:$0xff]  }
  0x58   :  { %996 = vmatprep.mubr.bf16.mxu1 %v132_v7  ;;  %v1705_v37 = vld [vmem:[#allocation7 + $0x26c] ss:$16 sps:$4 sm:$0xff]   ;;  %v1727_v56 = vld [vmem:[#allocation7 + $0x3e8] ss:$16 sps:$4 sm:$0xff]  }
  0x59   :  { %940 = vmatpush2.bf16.msra.mxu0 %v1631_v38  ;;  %v1700_v38 = vld [vmem:[#allocation7 + $0x68] ss:$16 sps:$4 sm:$0xff]   ;;  %v1726_v53 = vld [vmem:[#allocation7 + $0x1ec] ss:$16 sps:$4 sm:$0xff]  }
  0x5a   :  { %981 = vmatpush2.bf16.msra.mxu1 %v1632_v39  ;;  %941 = vmatprep.subr.bf16.mxu0 %v1633_v43  ;;  %v1703_v39 = vld [vmem:[#allocation7 + $0x268] ss:$16 sps:$4 sm:$0xff]   ;;  %v1735_v58 = vld [vmem:[#allocation7 + $0x3cc] ss:$16 sps:$4 sm:$0xff]  }
  0x5b   :  { %982 = vmatprep.subr.bf16.mxu1 %v1635_v44  ;;  %v1709_v43 = vld [vmem:[#allocation7 + $0x248] ss:$16 sps:$4 sm:$0xff]   ;;  %v1714_v44 = vld [vmem:[#allocation7 + $0x2c] ss:$16 sps:$4 sm:$0xff]  }
  0x5c   :  { %v1730_v59 = vld [vmem:[#allocation7 + $0x1c8] ss:$16 sps:$4 sm:$0xff]  }
  0x5d   :  { %942 = vmatpush2.bf16.msra.mxu0 %v1637_v45  ;;  %v1717_v45 = vld [vmem:[#allocation7 + $0x22c] ss:$16 sps:$4 sm:$0xff]   ;;  %v1736_v63 = vld [vmem:[#allocation7 + $0x1a8] ss:$16 sps:$4 sm:$0xff]  }
  0x5e   :  { %983 = vmatpush2.bf16.msra.mxu1 %v1638_v48  ;;  %943 = vmatprep.subr.bf16.mxu0 %v1639_v49  ;;  %v1715_v48 = vld [vmem:[#allocation7 + $0x228] ss:$16 sps:$4 sm:$0xff]   ;;  %v1720_v49 = vld [vmem:[#allocation7 + $0xc] ss:$16 sps:$4 sm:$0xff]  }
  0x5f   :  { %984 = vmatprep.subr.bf16.mxu1 %v1641_v50  ;;  %v1723_v50 = vld [vmem:[#allocation7 + $0x20c] ss:$16 sps:$4 sm:$0xff]   ;;  %v1739_v0 = vld [vmem:[#allocation7 + $0x3a8] ss:$16 sps:$4 sm:$0xff]  }
  0x60   :  { %v1742_v3 = vld [vmem:[#allocation7 + $0x188] ss:$16 sps:$4 sm:$0xff]  }
  0x61   :  { %944 = vmatpush2.bf16.msra.mxu0 %v1643_v51  ;;  %v1718_v51 = vld [vmem:[#allocation7 + $0x8] ss:$16 sps:$4 sm:$0xff]  }
  0x62   :  { %985 = vmatpush2.bf16.msra.mxu1 %v1644_v52  ;;  %945 = vmatprep.subr.bf16.mxu0 %v1645_v54  ;;  %v1721_v52 = vld [vmem:[#allocation7 + $0x208] ss:$16 sps:$4 sm:$0xff]   ;;  %v1729_v54 = vld [vmem:[#allocation7 + $0x3ec] ss:$16 sps:$4 sm:$0xff]  }
  0x63   :  { %986 = vmatprep.subr.bf16.mxu1 %v1647_v55  ;;  %v1724_v55 = vld [vmem:[#allocation7 + $0x1e8] ss:$16 sps:$4 sm:$0xff]  }
  0x65   :  { %946 = vmatpush2.bf16.msra.mxu0 %v1649_v57  ;;  %v1732_v57 = vld [vmem:[#allocation7 + $0x1cc] ss:$16 sps:$4 sm:$0xff]  }
  0x66   :  { %987 = vmatpush2.bf16.msra.mxu1 %v1650_v60  ;;  %947 = vmatprep.subr.bf16.mxu0 %v1651_v61  ;;  %v1733_v60 = vld [vmem:[#allocation7 + $0x3c8] ss:$16 sps:$4 sm:$0xff]   ;;  %v1738_v61 = vld [vmem:[#allocation7 + $0x1ac] ss:$16 sps:$4 sm:$0xff]  }
  0x67   :  { %988 = vmatprep.subr.bf16.mxu1 %v1653_v62  ;;  %v1741_v62 = vld [vmem:[#allocation7 + $0x3ac] ss:$16 sps:$4 sm:$0xff]  }
  0x69   :  { %948 = vmatpush2.bf16.msra.mxu0 %v1655_v1  ;;  %v1744_v1 = vld [vmem:[#allocation7 + $0x18c] ss:$16 sps:$4 sm:$0xff]  }
  0x6a   :  { %989 = vmatpush2.bf16.msra.mxu1 %v1656_v4  ;;  %949 = vmatprep.subr.bf16.mxu0 %v1657_v5  ;;  %v1745_v4 = vld [vmem:[#allocation7 + $0x388] ss:$16 sps:$4 sm:$0xff]   ;;  %v1750_v5 = vld [vmem:[#allocation7 + $0x16c] ss:$16 sps:$4 sm:$0xff]  }
  0x6b   :  { %990 = vmatprep.subr.bf16.mxu1 %v1659_v6  ;;  %v1753_v6 = vld [vmem:[#allocation7 + $0x36c] ss:$16 sps:$4 sm:$0xff]  }
  0x6d   :  { %950 = vmatpush2.bf16.msra.mxu0 %v1661_v8  ;;  %v1751_v8 = vld [vmem:[#allocation7 + $0x368] ss:$16 sps:$4 sm:$0xff]  }
  0x6e   :  { %991 = vmatpush2.bf16.msra.mxu1 %v1662_v9  ;;  %951 = vmatprep.subr.bf16.mxu0 %v1663_v10  ;;  %v1756_v9 = vld [vmem:[#allocation7 + $0x14c] ss:$16 sps:$4 sm:$0xff]  }
  0x6f   :  { %992 = vmatprep.subr.bf16.mxu1 %v1665_v11  ;;  %v1759_v10 = vld [vmem:[#allocation7 + $0x34c] ss:$16 sps:$4 sm:$0xff]   ;;  %v1754_v11 = vld [vmem:[#allocation7 + $0x148] ss:$16 sps:$4 sm:$0xff]  }
  0x71   :  { %952 = vmatpush2.bf16.msra.mxu0 %v1667_v12  ;;  %v1757_v12 = vld [vmem:[#allocation7 + $0x348] ss:$16 sps:$4 sm:$0xff]  }
  0x72   :  { %993 = vmatpush2.bf16.msra.mxu1 %v1668_v13  ;;  %953 = vmatprep.subr.bf16.mxu0 %v1669_v14  ;;  %v1762_v13 = vld [vmem:[#allocation7 + $0x12c] ss:$16 sps:$4 sm:$0xff]  }
  0x73   :  { %994 = vmatprep.subr.bf16.mxu1 %v1671_v15  ;;  %v1765_v14 = vld [vmem:[#allocation7 + $0x32c] ss:$16 sps:$4 sm:$0xff]   ;;  %v1760_v15 = vld [vmem:[#allocation7 + $0x128] ss:$16 sps:$4 sm:$0xff]  }
  0x75   :  { %954 = vmatpush2.bf16.msra.mxu0 %v1673_v16  ;;  %v1763_v16 = vld [vmem:[#allocation7 + $0x328] ss:$16 sps:$4 sm:$0xff]  }
  0x76   :  { %995 = vmatpush2.bf16.msra.mxu1 %v1674_v17  ;;  %1005 = vmatprep.subr.bf16.mxu0 %v1678_v18  ;;  %v1768_v17 = vld [vmem:[#allocation7 + $0x10c] ss:$16 sps:$4 sm:$0xff]  }
  0x77   :  { %1046 = vmatprep.subr.bf16.mxu1 %v1681_v19  ;;  %v1424_v18 = vld [vmem:[#allocation5] ss:$0 sm:$0xff] }
  0x78   :  { %956 = vmatmul.mubr.bf16.vlgmr.msra.gmra.mxu0 %v1944_v20  ;;  %v1771_v19 = vld [vmem:[#allocation7 + $0x30c] ss:$16 sps:$4 sm:$0xff]  }
  0x79   :  { %997 = vmatmul.mubr.bf16.vlgmr.msra.gmra.mxu1 %v1946_v21  ;;  %1006 = vmatpush1.bf16.msra.mxu0 %v1676_v22  ;;  %v1425_v22 = vld [vmem:[%s2115_s3] ss:$0 sm:$0xff] }
  0x7a   :  { %1047 = vmatpush1.bf16.msra.mxu1 %v1679_v23  ;;  %1007 = vmatprep.subr.bf16.mxu0 %v1684_v24  ;;  %v1766_v24 = vld [vmem:[#allocation7 + $0x108] ss:$16 sps:$4 sm:$0xff]  }
  0x7b   :  { %1048 = vmatprep.subr.bf16.mxu1 %v1687_v25  ;;  %1037 = vmatprep.mubr.bf16.mxu0 %v130_v2  ;;  %v1747_v2 = vld [vmem:[#allocation7 + $0x38c] ss:$16 sps:$4 sm:$0xff]  }
  0x7c   :  { %1078 = vmatprep.mubr.bf16.mxu1 %v132_v7  ;;  %v1748_v7 = vld [vmem:[#allocation7 + $0x168] ss:$16 sps:$4 sm:$0xff]  }
  0x7d   :  { %1008 = vmatpush1.bf16.msra.mxu0 %v1682_v26  ;;  %v1769_v26 = vld [vmem:[#allocation7 + $0x308] ss:$16 sps:$4 sm:$0xff]  }
  0x7e   :  { %1049 = vmatpush1.bf16.msra.mxu1 %v1685_v27  ;;  %1009 = vmatprep.subr.bf16.mxu0 %v1690_v28 }
  0x7f   :  { %1050 = vmatprep.subr.bf16.mxu1 %v1693_v29  ;;  %v1867_v29 = vmov 3  }
  0x81   :  { %1010 = vmatpush1.bf16.msra.mxu0 %v1688_v30  ;;  %v1868_v30 = vmov 2  }
  0x82   :  { %1051 = vmatpush1.bf16.msra.mxu1 %v1691_v31  ;;  %1011 = vmatprep.subr.bf16.mxu0 %v1696_v32  ;;  %v1869_v31 = vmov 6   ;;  %v1870_v32 = vmov 4  }
  0x83   :  { %1052 = vmatprep.subr.bf16.mxu1 %v1699_v33  ;;  %v1871_v33 = vmov 7  }
  0x85   :  { %1012 = vmatpush1.bf16.msra.mxu0 %v1694_v34  ;;  %v1872_v34 = vmov 5  }
  0x86   :  { %1053 = vmatpush1.bf16.msra.mxu1 %v1697_v35  ;;  %1013 = vmatprep.subr.bf16.mxu0 %v1702_v36 }
  0x87   :  { %1054 = vmatprep.subr.bf16.mxu1 %v1705_v37 }
  0x89   :  { %1014 = vmatpush1.bf16.msra.mxu0 %v1700_v38 }
  0x8a   :  { %1055 = vmatpush1.bf16.msra.mxu1 %v1703_v39  ;;  %1015 = vmatprep.subr.bf16.mxu0 %v1708_v40 }
  0x8b   :  { %1056 = vmatprep.subr.bf16.mxu1 %v1711_v41  ;;  %v1956_v41 = vsub.s32 1, %v1941_v47 }
  0x8d   :  { %1016 = vmatpush1.bf16.msra.mxu0 %v1706_v42  ;;  %v1961_v42 = vld [vmem:[%s2118_s6] sm:$0xf] }
  0x8e   :  { %1057 = vmatpush1.bf16.msra.mxu1 %v1709_v43  ;;  %1017 = vmatprep.subr.bf16.mxu0 %v1714_v44  ;;  %v1964_v43 = vsub.s32 0, %v1941_v47  ;;  %v270_v44 = vrot.slane %v1961_v42, %v1956_v41 }
  0x8f   :  { %1058 = vmatprep.subr.bf16.mxu1 %v1717_v45 }
  0x90   :  { %v266_v45 = vrot.slane %v1961_v42, %v1964_v43 }
  0x91   :  { %1018 = vmatpush1.bf16.msra.mxu0 %v1712_v46  ;;  %v1970_v46 = vld [vmem:[#allocation8] ss:$8 sm:$0xf] }
  0x92   :  { %1059 = vmatpush1.bf16.msra.mxu1 %v1715_v48  ;;  %1019 = vmatprep.subr.bf16.mxu0 %v1720_v49 }
  0x93   :  { %1060 = vmatprep.subr.bf16.mxu1 %v1723_v50  ;;  %v1101_v50 = vrot.slane %v1970_v46, %v1956_v41 }
  0x95   :  { %1020 = vmatpush1.bf16.msra.mxu0 %v1718_v51 }
  0x96   :  { %1061 = vmatpush1.bf16.msra.mxu1 %v1721_v52  ;;  %1021 = vmatprep.subr.bf16.mxu0 %v1726_v53  ;;  %v1976_v52 = vld [vmem:[#allocation8 + $0x1] ss:$8 sm:$0xf]  ;;  %v1097_v53 = vrot.slane %v1970_v46, %v1964_v43 }
  0x97   :  { %1062 = vmatprep.subr.bf16.mxu1 %v1729_v54  ;;  %v1136_v54 = vrot.slane %v1976_v52, %v1956_v41 }
  0x99   :  { %1022 = vmatpush2.bf16.msra.mxu0 %v1724_v55 }
  0x9a   :  { %1063 = vmatpush2.bf16.msra.mxu1 %v1727_v56  ;;  %1023 = vmatprep.subr.bf16.mxu0 %v1732_v57 }
  0x9b   :  { %1064 = vmatprep.subr.bf16.mxu1 %v1735_v58  ;;  %v1132_v58 = vrot.slane %v1976_v52, %v1964_v43 }
  0x9d   :  { %1024 = vmatpush2.bf16.msra.mxu0 %v1730_v59 }
  0x9e   :  { %1065 = vmatpush2.bf16.msra.mxu1 %v1733_v60  ;;  %1025 = vmatprep.subr.bf16.mxu0 %v1738_v61  ;;  %v1987_v60 = vld [vmem:[#allocation8 + $0x2] ss:$8 sm:$0xf] }
  0x9f   :  { %1066 = vmatprep.subr.bf16.mxu1 %v1741_v62 }
  0xa1   :  { %1026 = vmatpush2.bf16.msra.mxu0 %v1736_v63 }
  0xa2   :  { %1067 = vmatpush2.bf16.msra.mxu1 %v1739_v0  ;;  %1027 = vmatprep.subr.bf16.mxu0 %v1744_v1  ;;  %v1171_v0 = vrot.slane %v1987_v60, %v1956_v41 }
  0xa3   :  { %1068 = vmatprep.subr.bf16.mxu1 %v1747_v2 }
  0xa5   :  { %1028 = vmatpush2.bf16.msra.mxu0 %v1742_v3  ;;  %v1167_v3 = vrot.slane %v1987_v60, %v1964_v43 }
  0xa6   :  { %1069 = vmatpush2.bf16.msra.mxu1 %v1745_v4  ;;  %1029 = vmatprep.subr.bf16.mxu0 %v1750_v5  ;;  %v1998_v5 = vld [vmem:[#allocation8 + $0x3] ss:$8 sm:$0xf] }
  0xa7   :  { %1070 = vmatprep.subr.bf16.mxu1 %v1753_v6 }
  0xa9   :  { %1030 = vmatpush2.bf16.msra.mxu0 %v1748_v7 }
  0xaa   :  { %1071 = vmatpush2.bf16.msra.mxu1 %v1751_v8  ;;  %1031 = vmatprep.subr.bf16.mxu0 %v1756_v9  ;;  %v1206_v8 = vrot.slane %v1998_v5, %v1956_v41 }
  0xab   :  { %1072 = vmatprep.subr.bf16.mxu1 %v1759_v10 }
  0xad   :  { %1032 = vmatpush2.bf16.msra.mxu0 %v1754_v11  ;;  %v1202_v11 = vrot.slane %v1998_v5, %v1964_v43 }
  0xae   :  { %1073 = vmatpush2.bf16.msra.mxu1 %v1757_v12  ;;  %1033 = vmatprep.subr.bf16.mxu0 %v1762_v13  ;;  %v2006_v12 = vld [vmem:[#allocation8 + $0x4] ss:$8 sm:$0xf] }
  0xaf   :  { %1074 = vmatprep.subr.bf16.mxu1 %v1765_v14 }
  0xb1   :  { %1034 = vmatpush2.bf16.msra.mxu0 %v1760_v15  ;;  %v1241_v15 = vrot.slane %v2006_v12, %v1956_v41 }
  0xb2   :  { %1075 = vmatpush2.bf16.msra.mxu1 %v1763_v16  ;;  %1035 = vmatprep.subr.bf16.mxu0 %v1768_v17 }
  0xb3   :  { %v88_v23 = vpop.permute.xlu0 %87  ;;  %1076 = vmatprep.subr.bf16.mxu1 %v1771_v19  ;;  %v1237_v19 = vrot.slane %v2006_v12, %v1964_v43 }
  0xb4   :  { %v96_v25 = vmul.f32 %v1424_v18, %v88_v23  ;;  %v2018_v23 = vld [vmem:[#allocation8 + $0x5] ss:$8 sm:$0xf] }
  0xb5   :  { %1036 = vmatpush2.bf16.msra.mxu0 %v1766_v24 }
  0xb6   :  { %v104_v27 = vadd.f32 %v1425_v22, %v96_v25  ;;  %1077 = vmatpush2.bf16.msra.mxu1 %v1769_v26  ;;  %v1276_v26 = vrot.slane %v2018_v23, %v1956_v41 }
  0xb8   :  { %v105_v28 = vmax.f32 %v104_v27, 0.0  ;;  %1038 = vmatmul.mubr.bf16.vlgmr.msra.gmra.mxu0 %v1944_v20  ;;  %v2024_v27 = vsub.s32 2, %v1941_v47 }
  0xb9   :  { %1079 = vmatmul.mubr.bf16.vlgmr.msra.gmra.mxu1 %v1946_v21 }
  0xba   :  { %1090 = vperm.xlu0 %1570, %v105_v28   ;;  %1125 = vperm.xlu1 %1571, %v105_v28  }
  0xbe   :  { %1573 = vset.pattern.permute.xlu0 %v1867_v29  ;;  %1572 = vset.pattern.permute.xlu1 %v1868_v30  ;;  %v1272_v30 = vrot.slane %v2018_v23, %v1964_v43 }
  0xbf   :  { %1195 = vperm.xlu0 %1573, %v105_v28   ;;  %1160 = vperm.xlu1 %1572, %v105_v28  }
  0xc3   :  { %1576 = vset.pattern.permute.xlu0 %v1869_v31  ;;  %1574 = vset.pattern.permute.xlu1 %v1870_v32  ;;  %v2030_v31 = vsub.s32 3, %v1941_v47 }
  0xc4   :  { %1300 = vperm.xlu0 %1576, %v105_v28   ;;  %1230 = vperm.xlu1 %1574, %v105_v28  }
  0xc8   :  { %1578 = vset.pattern.permute.xlu0 %v1871_v33  ;;  %1575 = vset.pattern.permute.xlu1 %v1872_v34 }
  0xc9   :  { %1265 = vperm.xlu1 %1575, %v105_v28  }
  0xcd   :  { %1577 = vset.pattern.permute.xlu1 %v1871_v33  ;;  %v2034_v33 = vld [vmem:[#allocation8 + $0x6] ss:$8 sm:$0xf] }
  0xce   :  { %1335 = vperm.xlu1 %1577, %v105_v28  }
 0x135   :  { %v1974_v51 = vpop.permute.xlu0 %1090  ;;  %v1982_v56 = vpop.permute.xlu1 %1125 }
 0x136   :  { %v1115_v59 = vmul.f32 %v1101_v50, %v1974_v51  ;;  %v1114_v61 = vmul.f32 %v1097_v53, %v1974_v51  ;;  %v1150_v62 = vmul.f32 %v1136_v54, %v1982_v56  ;;  %v1149_v2 = vmul.f32 %v1132_v58, %v1982_v56 }
 0x137   :  { %v1175_v58 = vrot.slane %v1987_v60, %v2024_v27 }
 0x138   :  { %v957_v20 = vpop.f32.mrf.mxu0 }
 0x139   :  { %v998_v21 = vpop.f32.mrf.mxu1  ;;  %v958_v49 = vadd.f32 %v957_v20, %v266_v45 }
 0x13a   :  { %v959_v35 = vpop.f32.mrf.mxu0  ;;  %v1996_v4 = vpop.permute.xlu1 %1160 }
 0x13b   :  { %v1000_v36 = vpop.f32.mrf.mxu1  ;;  %v960_v48 = vadd.f32 %v959_v35, %v270_v44  ;;  %v999_v57 = vadd.f32 %v998_v21, %v958_v49  ;;  %v1185_v7 = vmul.f32 %v1171_v0, %v1996_v4  ;;  %v1184_v10 = vmul.f32 %v1167_v3, %v1996_v4  ;;  %v2008_v13 = vpop.permute.xlu0 %1195 }
 0x13c   :  { %v961_v37 = vpop.f32.mrf.mxu0  ;;  %v1220_v16 = vmul.f32 %v1206_v8, %v2008_v13  ;;  %v1219_v22 = vmul.f32 %v1202_v11, %v2008_v13  ;;  %v1311_v21 = vrot.slane %v2034_v33, %v1956_v41  ;;  %v274_v35 = vrot.slane %v1961_v42, %v2024_v27 }
 0x13d   :  { %v1002_v38 = vpop.f32.mrf.mxu1  ;;  %v1001_v55 = vadd.f32 %v1000_v36, %v960_v48  ;;  %v1118_v1 = vadd.f32 %v1114_v61, %v999_v57  ;;  %v1105_v36 = vrot.slane %v1970_v46, %v2024_v27  ;;  %v1140_v44 = vrot.slane %v1976_v52, %v2024_v27 }
 0x13e   :  { %v962_v39 = vpop.f32.mrf.mxu0  ;;  %v1307_v38 = vrot.slane %v2034_v33, %v1964_v43  ;;  %v1109_v49 = vrot.slane %v1970_v46, %v2030_v31 }
 0x13f   :  { %v1003_v40 = vpop.f32.mrf.mxu1  ;;  %v1119_v63 = vadd.f32 %v1115_v59, %v1001_v55  ;;  %v1153_v9 = vadd.f32 %v1149_v2, %v1118_v1  ;;  %v2013_v17 = vpop.permute.xlu1 %1230  ;;  %v2046_v39 = vld [vmem:[#allocation8 + $0x7] ss:$8 sm:$0xf]  ;;  %v1116_v61 = vmul.f32 %v1105_v36, %v1974_v51  ;;  %v1151_v3 = vmul.f32 %v1140_v44, %v1982_v56 }
 0x140   :  { %v1255_v24 = vmul.f32 %v1241_v15, %v2013_v17  ;;  %v1254_v28 = vmul.f32 %v1237_v19, %v2013_v17  ;;  %v278_v40 = vrot.slane %v1961_v42, %v2030_v31  ;;  %v2052_v45 = vpop.permute.xlu0 %1300  ;;  %v1346_v54 = vrot.slane %v2046_v39, %v1956_v41 }
 0x141   :  { %v1154_v6 = vadd.f32 %v1150_v62, %v1119_v63  ;;  %v1188_v18 = vadd.f32 %v1184_v10, %v1153_v9  ;;  %v1325_v53 = vmul.f32 %v1311_v21, %v2052_v45  ;;  %v1144_v42 = vrot.slane %v1976_v52, %v2030_v31 }
 0x142   :  { %v1342_v59 = vrot.slane %v2046_v39, %v1964_v43  ;;  %v1324_v63 = vmul.f32 %v1307_v38, %v2052_v45  ;;  %v1179_v52 = vrot.slane %v1987_v60, %v2030_v31  ;;  %v1117_v8 = vmul.f32 %v1109_v49, %v1974_v51 }
 0x143   :  { %v1189_v14 = vadd.f32 %v1185_v7, %v1154_v6  ;;  %v1223_v29 = vadd.f32 %v1219_v22, %v1188_v18  ;;  %v1210_v6 = vrot.slane %v1998_v5, %v2024_v27  ;;  %v1152_v18 = vmul.f32 %v1144_v42, %v1982_v56 }
 0x144   :  { %v2032_v32 = vpop.permute.xlu1 %1265  ;;  %v1186_v19 = vmul.f32 %v1175_v58, %v1996_v4  ;;  %v1245_v22 = vrot.slane %v2006_v12, %v2024_v27  ;;  %v1214_v60 = vrot.slane %v1998_v5, %v2030_v31  ;;  %v1280_v56 = vrot.slane %v2018_v23, %v2024_v27 }
 0x145   :  { %v1224_v25 = vadd.f32 %v1220_v16, %v1189_v14  ;;  %v1290_v34 = vmul.f32 %v1276_v26, %v2032_v32  ;;  %v1289_v37 = vmul.f32 %v1272_v30, %v2032_v32  ;;  %v1258_v47 = vadd.f32 %v1254_v28, %v1223_v29 }
 0x146   :  { %v1249_v30 = vrot.slane %v2006_v12, %v2030_v31  ;;  %v1222_v5 = vmul.f32 %v1214_v60, %v2008_v13  ;;  %v1256_v12 = vmul.f32 %v1245_v22, %v2013_v17  ;;  %v1354_v42 = vrot.slane %v2046_v39, %v2030_v31 }
 0x147   :  { %v1259_v20 = vadd.f32 %v1255_v24, %v1224_v25  ;;  %v1293_v62 = vadd.f32 %v1289_v37, %v1258_v47  ;;  %v1284_v37 = vrot.slane %v2018_v23, %v2030_v31  ;;  %v1315_v47 = vrot.slane %v2034_v33, %v2024_v27 }
 0x148   :  { %v1350_v23 = vrot.slane %v2046_v39, %v2024_v27 }
 0x149   :  { %v1294_v50 = vadd.f32 %v1290_v34, %v1259_v20  ;;  %v1336_v7 = vpop.permute.xlu1 %1335  ;;  %v1328_v25 = vadd.f32 %v1324_v63, %v1293_v62  ;;  %v1221_v34 = vmul.f32 %v1210_v6, %v2008_v13  ;;  %v1187_v20 = vmul.f32 %v1179_v52, %v1996_v4  ;;  %v1371_v4 = vld [vmem:[%s2119_s7] sm:$0xf] }
 0x14a   :  { %v1360_v11 = vmul.f32 %v1346_v54, %v1336_v7  ;;  %v1359_v26 = vmul.f32 %v1342_v59, %v1336_v7  ;;  %v1319_v13 = vrot.slane %v2034_v33, %v2030_v31  ;;  %v1380_v49 = vrot.slane %v1371_v4, %v1956_v41 }
 0x14b   :  { %v1329_v10 = vadd.f32 %v1325_v53, %v1294_v50  ;;  %v1291_v50 = vmul.f32 %v1280_v56, %v2032_v32  ;;  %v1292_v58 = vmul.f32 %v1284_v37, %v2032_v32  ;;  %v1361_v41 = vmul.f32 %v1350_v23, %v1336_v7 }
 0x14c   :  { %v1363_v38 = vadd.f32 %v1359_v26, %v1328_v25  ;;  %v1388_v32 = vrot.slane %v1371_v4, %v2030_v31 }
 0x14d   :  { %v1364_v21 = vadd.f32 %v1360_v11, %v1329_v10 }
 0x14e   :  { %v1367_v33 = vmax.f32 %v1363_v38, 0.0 }
 0x14f   :  { %v1368_v53 = vmax.f32 %v1364_v21, 0.0 }
 0x178   :  { %v1039_v48 = vpop.f32.mrf.mxu0 }
 0x179   :  { %v1040_v55 = vadd.f32 %v1039_v48, %v274_v35  ;;  %v1080_v57 = vpop.f32.mrf.mxu1  ;;  %v1257_v48 = vmul.f32 %v1249_v30, %v2013_v17  ;;  %v1376_v17 = vrot.slane %v1371_v4, %v1964_v43 }
 0x17a   :  { %v1041_v46 = vpop.f32.mrf.mxu0 }
 0x17b   :  { %v1081_v0 = vadd.f32 %v1080_v57, %v1040_v55  ;;  %v1042_v1 = vadd.f32 %v1041_v46, %v278_v40  ;;  %v1082_v2 = vpop.f32.mrf.mxu1  ;;  %v1326_v57 = vmul.f32 %v1315_v47, %v2052_v45  ;;  %v1327_v46 = vmul.f32 %v1319_v13, %v2052_v45 }
 0x17c   :  { %v1043_v9 = vpop.f32.mrf.mxu0  ;;  %v1393_v6 = vmul.f32 %v1376_v17, %v1367_v33 }
 0x17d   :  { %v1120_v14 = vadd.f32 %v1116_v61, %v1081_v0  ;;  %v1083_v15 = vadd.f32 %v1082_v2, %v1042_v1  ;;  %v1084_v16 = vpop.f32.mrf.mxu1  ;;  %v1394_v0 = vmul.f32 %v1380_v49, %v1368_v53  ;;  %v1384_v1 = vrot.slane %v1371_v4, %v2024_v27  ;;  %v1554_v27 = vld [vmem:[#allocation2] ss:$0 sm:$0xff] }
 0x17e   :  { %v1044_v24 = vpop.f32.mrf.mxu0  ;;  %v1362_v2 = vmul.f32 %v1354_v42, %v1336_v7  ;;  %v1398_v11 = vsel %vm1397_vm0, %v1393_v6, 0.0 }
 0x17f   :  { %v1155_v51 = vadd.f32 %v1151_v3, %v1120_v14  ;;  %v1121_v28 = vadd.f32 %v1117_v8, %v1083_v15  ;;  %v1085_v29 = vpop.f32.mrf.mxu1  ;;  %v1399_v8 = vsel %vm1397_vm0, %v1394_v0, 0.0 }
 0x180   :  { %v1400_v45 = vadd.f32 %v1399_v8, %v1398_v11 }
 0x181   :  { %v1190_v35 = vadd.f32 %v1186_v19, %v1155_v51  ;;  %v1156_v36 = vadd.f32 %v1152_v18, %v1121_v28 }
 0x183   :  { %v1225_v40 = vadd.f32 %v1221_v34, %v1190_v35  ;;  %v1191_v44 = vadd.f32 %v1187_v20, %v1156_v36 }
 0x185   :  { %v1260_v54 = vadd.f32 %v1256_v12, %v1225_v40  ;;  %v1226_v55 = vadd.f32 %v1222_v5, %v1191_v44 }
 0x187   :  { %v1295_v59 = vadd.f32 %v1291_v50, %v1260_v54  ;;  %v1261_v61 = vadd.f32 %v1257_v48, %v1226_v55 }
 0x189   :  { %v1296_v62 = vadd.f32 %v1292_v58, %v1261_v61  ;;  %v1330_v63 = vadd.f32 %v1326_v57, %v1295_v59 }
 0x18b   :  { %v1331_v3 = vadd.f32 %v1327_v46, %v1296_v62  ;;  %v1365_v52 = vadd.f32 %v1361_v41, %v1330_v63 }
 0x18d   :  { %v1366_v39 = vadd.f32 %v1362_v2, %v1331_v3  ;;  %v1369_v43 = vmax.f32 %v1365_v52, 0.0 }
 0x18f   :  { %v1370_v9 = vmax.f32 %v1366_v39, 0.0  ;;  %v1395_v10 = vmul.f32 %v1384_v1, %v1369_v43 }
 0x191   :  { %v1396_v14 = vmul.f32 %v1388_v32, %v1370_v9  ;;  %v1401_v15 = vsel %vm1397_vm0, %v1395_v10, 0.0 }
 0x192   :  { %v1402_v16 = vadd.f32 %v1401_v15, %v1400_v45 }
 0x193   :  { %v1403_v18 = vsel %vm1397_vm0, %v1396_v14, 0.0 }
 0x194   :  { %v1404_v19 = vadd.f32 %v1403_v18, %v1402_v16 }
 0x196   :  { %1405 = vadd.xlane.f32.xlu1 %v1404_v19 }
 0x21f   :  { %v1406_v7 = vpop.xlane.xlu1 %1405 }
 0x220   :  { %v1414_v22 = vadd.f32 %v1554_v27, %v1406_v7 }
 0x222   :  { %1416 = vst.msk [vmem:[%s2121_s9] sm:$0x3] %vm1415_vm1, %v1414_v22 }
 0x223   :  { %1421 = vsyncpa [#allocation4], 1 }
 0x224   :  { %1422 = vsyncpa [#allocation6], 1 }
 0x225   :  { %1423 = vsyncpa [#allocation9], 1 }

</bundles_post_ra>
